<compile_context>
chip_gen: v6e
topology: v6e:2x2x1
jax: 0.10.0
libtpu: 0.0.40
codegen_flags: <defaults>
</compile_context>

<pallas_src>
import functools

import jax
import jax.numpy as jnp
from jax.experimental import pallas as pl
from jax.experimental.pallas import tpu as pltpu


def _round_up(x, m):
    return (x + m - 1) // m * m


VMEM_SPEC = pl.BlockSpec(memory_space=pltpu.MemorySpace.VMEM)


# ---------------------------------------------------------------------------
# Encoder kernel: fused conv-stem + bias + ReLU + GAP + fc + ReLU + Dropout.
# One image per (parallel) grid step.
# ---------------------------------------------------------------------------

def encoder_kernel(xcol_ref, w_ref, b_ref, pool_ref, fcw_ref, fcb_ref, u_ref,
                   o_ref, *, inv_hw):
    """xcol_ref: [Np_pad, K_pad]  bf16  im2col'd patches (lane-dense, K=128)
       w_ref:    [K_pad, Cf]      bf16  conv weights (zero pad rows)
       b_ref:    [1, Cf]          f32
       pool_ref: [1, Np_pad]      bf16  1.0 on valid pixels, 0.0 on pad rows
       fcw_ref:  [Cf, E_pad]      bf16  fc head (zero pad cols)
       fcb_ref:  [1, E_pad]       f32
       u_ref:    [1, E_pad]       f32   dropout uniforms
       o_ref:    [1, E_pad]       f32   encoder features (pad lanes stay 0)
    """
    # Single wide-K lane-dense contraction (replaces 9 K=8 tap matmuls).
    feat = jnp.dot(xcol_ref[...], w_ref[...],
                   preferred_element_type=jnp.float32) + b_ref[...]
    feat = jnp.maximum(feat, 0.0)                                # bias + ReLU
    # Global average pool as an MXU matvec; mask row kills pad rows.
    pooled = jnp.dot(pool_ref[...], feat.astype(jnp.bfloat16),
                     preferred_element_type=jnp.float32) * inv_hw   # [1, Cf]
    # Encoder fc head fused in: pooled never leaves VMEM.
    x = jnp.dot(pooled.astype(jnp.bfloat16), fcw_ref[...],
                preferred_element_type=jnp.float32) + fcb_ref[...]
    x = jnp.maximum(x, 0.0)                                      # self.relu
    keep = u_ref[...] < 0.5                                      # Dropout(0.5)
    o_ref[...] = jnp.where(keep, x * 2.0, 0.0)                   # 1/(1-p) = 2


def encoder_forward(images_nchw, p, key):
    """EncoderCNN.forward: backbone stand-in -> fc -> ReLU -> Dropout."""
    b, cin, h, w = images_nchw.shape
    k_pad, cf = p["conv_w"].shape
    e_pad = p["fc_w"].shape[1]
    np_ = h * w
    np_pad = _round_up(np_, 8)

    # Host-side lane packing of the 3x3 patches (channels+taps in the lane
    # axis) -> one K=128 contraction in-kernel with lane-dense loads.
    x = jnp.transpose(images_nchw, (0, 2, 3, 1))                 # NCHW -> NHWC
    xp = jnp.pad(x, ((0, 0), (1, 1), (1, 1), (0, 0)))            # halo pad
    taps = [xp[:, kh:kh + h, kw:kw + w, :]
            for kh in range(3) for kw in range(3)]               # kh-major
    xcol = jnp.concatenate(taps, axis=-1).reshape(b, np_, 9 * cin)
    xcol = jnp.pad(xcol, ((0, 0), (0, np_pad - np_), (0, k_pad - 9 * cin)))
    xcol = xcol.astype(jnp.bfloat16)

    # Valid-pixel indicator row (pad rows excluded from the pool).
    pool_row = (jnp.arange(np_pad) < np_).astype(jnp.bfloat16).reshape(1, np_pad)
    # Dropout randomness from the host key (no in-kernel PRNG needed).
    u = jax.random.uniform(key, (b, 1, e_pad), jnp.float32)

    feat = pl.pallas_call(
        functools.partial(encoder_kernel, inv_hw=1.0 / np_),
        grid=(b,),
        in_specs=[
            pl.BlockSpec((None, np_pad, k_pad), lambda i: (i, 0, 0)),
            pl.BlockSpec((k_pad, cf), lambda i: (0, 0)),
            pl.BlockSpec((1, cf), lambda i: (0, 0)),
            pl.BlockSpec((1, np_pad), lambda i: (0, 0)),
            pl.BlockSpec((cf, e_pad), lambda i: (0, 0)),
            pl.BlockSpec((1, e_pad), lambda i: (0, 0)),
            pl.BlockSpec((None, 1, e_pad), lambda i: (i, 0, 0)),
        ],
        out_specs=pl.BlockSpec((None, 1, e_pad), lambda i: (i, 0, 0)),
        out_shape=jax.ShapeDtypeStruct((b, 1, e_pad), jnp.float32),
        compiler_params=pltpu.CompilerParams(
            dimension_semantics=("parallel",)),      # 1 image / TC on v7x
    )(xcol, p["conv_w"], p["conv_b"], pool_row, p["fc_w"], p["fc_b"], u)
    # Features stay E_pad(=128)-wide; pad lanes are exactly zero and the
    # decoder's layer-0 Wih has zero pad rows, so the math matches E=32.
    return feat.reshape(b, e_pad)


# ---------------------------------------------------------------------------
# Decoder kernel: embedding + dropout + stacked LSTM + linear, fully fused.
# ---------------------------------------------------------------------------

def make_decoder_kernel(num_layers, hidden):
    def kernel(*refs):
        ids_ref, feat_ref, tbl_ref, u_ref = refs[:4]
        layer_refs = refs[4:4 + 3 * num_layers]       # (wih, whh, b) per layer
        lin_w_ref, lin_b_ref, out_ref = refs[4 + 3 * num_layers:]

        t1, batch, _ = out_ref.shape                  # T+1, B, V

        def sigmoid(z):                               # EUP recip, not a divide
            return pl.reciprocal(1.0 + jnp.exp(-z), approx=True)

        def cell(gates, c_prev):                      # torch gate order i,f,g,o
            i_g = sigmoid(gates[:, 0 * hidden:1 * hidden])
            f_g = sigmoid(gates[:, 1 * hidden:2 * hidden])
            g_g = jnp.tanh(gates[:, 2 * hidden:3 * hidden])
            o_g = sigmoid(gates[:, 3 * hidden:4 * hidden])
            c = f_g * c_prev + i_g * g_g
            return o_g * jnp.tanh(c), c

        # Embedding lookup (one-hot MXU matmul over the small vocab) +
        # Dropout(0.5) in training mode.
        # TODO(synk): at real vocab sizes replace the one-hot matmul with a
        # scalar-prefetch / DMA row gather against an HBM-resident table.
        ids = ids_ref[...]                                      # [T*B, 1] i32
        n, v = ids.shape[0], tbl_ref.shape[0]
        onehot = ids == jax.lax.broadcasted_iota(jnp.int32, (n, v), 1)
        emb = jnp.dot(onehot.astype(jnp.bfloat16), tbl_ref[...],
                      preferred_element_type=jnp.float32)       # [T*B, E_pad]
        emb = jnp.where(u_ref[...] < 0.5, emb * 2.0, 0.0)

        # Hoist layer-0 input-to-hidden matmuls out of the recurrence:
        # features feed t=0, embeddings feed t>=1 (no host-side concat).
        wih0, whh0, b0 = layer_refs[0], layer_refs[1], layer_refs[2]
        g_feat = jnp.dot(feat_ref[...].astype(jnp.bfloat16), wih0[...],
                         preferred_element_type=jnp.float32) + b0[...]
        g_emb = jnp.dot(emb.astype(jnp.bfloat16), wih0[...],
                        preferred_element_type=jnp.float32) + b0[...]

        h = [jnp.zeros((batch, hidden), jnp.float32) for _ in range(num_layers)]
        c = [jnp.zeros((batch, hidden), jnp.float32) for _ in range(num_layers)]

        for t in range(t1):                 # static unroll; T+1 is small here
            g_in = g_feat if t == 0 else g_emb[(t - 1) * batch:t * batch, :]
            gates = g_in + jnp.dot(h[0].astype(jnp.bfloat16), whh0[...],
                                   preferred_element_type=jnp.float32)
            h[0], c[0] = cell(gates, c[0])
            for l in range(1, num_layers):
                wih, whh, bl = layer_refs[3 * l:3 * l + 3]
                gates = (jnp.dot(h[l - 1].astype(jnp.bfloat16), wih[...],
                                 preferred_element_type=jnp.float32)
                         + jnp.dot(h[l].astype(jnp.bfloat16), whh[...],
                                   preferred_element_type=jnp.float32)
                         + bl[...])
                h[l], c[l] = cell(gates, c[l])
            # Lane-dense [B, V=128] logits straight into the VMEM-resident
            # output slab (written back to HBM once, at the end of the call).
            out_ref[t] = jnp.dot(h[-1].astype(jnp.bfloat16), lin_w_ref[...],
                                 preferred_element_type=jnp.float32) + lin_b_ref[...]
    return kernel


def decoder_forward(features, captions, p, key):
    """DecoderRNN.forward — one fused pallas_call."""
    t, b = captions.shape
    e_pad = features.shape[1]
    v = p["embed"].shape[0]
    hd = p["lstm"][0]["whh"].shape[0]
    nl = len(p["lstm"])

    ids = captions.reshape(t * b, 1).astype(jnp.int32)
    u = jax.random.uniform(key, (t * b, e_pad), jnp.float32)

    layer_args = []
    for lp in p["lstm"]:
        layer_args += [lp["wih"], lp["whh"], lp["b"]]

    n_in = 4 + 3 * nl + 2
    return pl.pallas_call(
        make_decoder_kernel(nl, hd),
        out_shape=jax.ShapeDtypeStruct((t + 1, b, v), jnp.float32),
        in_specs=[VMEM_SPEC] * n_in,
        out_specs=VMEM_SPEC,
    )(ids, features, p["embed"], u, *layer_args, p["lin_w"], p["lin_b"])


def cnn_to_rnn_forward(images, captions, params, key):
    k_enc, k_dec = jax.random.split(key)
    features = encoder_forward(images, params["encoder"], k_enc)
    return decoder_forward(features, captions, params["decoder"], k_dec)


if __name__ == "__main__":
    # Small shapes consistent with CNNtoRNN.forward(images, captions).
    B, CIN, HIMG, WIMG = 2, 3, 16, 16     # images (Inception expects 3-channel)
    T = 8                                 # caption length (seq-first, [T, B])
    EMBED = 32                            # embedSize
    HIDDEN = 32                           # hiddenSize (4H = 128 lanes)
    VOCAB = 128                           # vocabSize (lane-dense logits)
    NUM_LAYERS = 2                        # numLayers
    CFEAT = 128                           # stand-in inception.fc.in_features
    K_PAD = 128                           # conv contraction 9*CIN=27 -> 128
    E_PAD = 128                           # embed/feature dim -> 128 lanes

    key = jax.random.PRNGKey(0)
    ks = jax.random.split(key, 16)

    images = jax.random.normal(ks[0], (B, CIN, HIMG, WIMG), jnp.float32)
    captions = jax.random.randint(ks[1], (T, B), 0, VOCAB, jnp.int32)

    # ---- parameters created in PyTorch layouts, converted for the kernels --
    conv_w_t = jax.random.normal(ks[2], (CFEAT, CIN, 3, 3), jnp.float32) * 0.1
    conv_b = jax.random.normal(ks[3], (CFEAT,), jnp.float32) * 0.1
    fc_w_t = jax.random.normal(ks[4], (EMBED, CFEAT), jnp.float32) * 0.1
    fc_b = jax.random.normal(ks[5], (EMBED,), jnp.float32) * 0.1

    # [Cout,Cin,kh,kw] -> [kh,kw,Cin,Cout] -> [9*Cin, Cout], pad K to 128.
    conv_w = jnp.transpose(conv_w_t, (2, 3, 1, 0)).reshape(9 * CIN, CFEAT)
    conv_w = jnp.pad(conv_w, ((0, K_PAD - 9 * CIN), (0, 0)))
    fc_w = jnp.pad(fc_w_t.T, ((0, 0), (0, E_PAD - EMBED)))     # [Cfeat, E_pad]
    fc_b_p = jnp.pad(fc_b, (0, E_PAD - EMBED))

    encoder_params = {
        "conv_w": conv_w.astype(jnp.bfloat16),
        "conv_b": conv_b.reshape(1, CFEAT),
        "fc_w": fc_w.astype(jnp.bfloat16),
        "fc_b": fc_b_p.reshape(1, E_PAD),
    }

    embed_t = jax.random.normal(ks[6], (VOCAB, EMBED), jnp.float32) * 0.1
    embed_pad = jnp.pad(embed_t, ((0, 0), (0, E_PAD - EMBED)))  # zero pad cols

    lstm_layers = []
    for layer in range(NUM_LAYERS):
        e_in = EMBED if layer == 0 else HIDDEN
        kk = jax.random.split(ks[7 + layer], 4)
        wih_t = jax.random.normal(kk[0], (4 * HIDDEN, e_in), jnp.float32) * 0.1
        whh_t = jax.random.normal(kk[1], (4 * HIDDEN, HIDDEN), jnp.float32) * 0.1
        bih = jax.random.normal(kk[2], (4 * HIDDEN,), jnp.float32) * 0.1
        bhh = jax.random.normal(kk[3], (4 * HIDDEN,), jnp.float32) * 0.1
        wih = wih_t.T                                          # [E_in, 4H]
        if layer == 0:
            wih = jnp.pad(wih, ((0, E_PAD - EMBED), (0, 0)))   # zero pad rows
        lstm_layers.append({
            "wih": wih.astype(jnp.bfloat16),
            "whh": whh_t.T.astype(jnp.bfloat16),               # [H, 4H]
            "b": (bih + bhh).reshape(1, 4 * HIDDEN),           # f32
        })

    lin_w_t = jax.random.normal(ks[10], (VOCAB, HIDDEN), jnp.float32) * 0.1
    lin_b = jax.random.normal(ks[11], (VOCAB,), jnp.float32) * 0.1

    decoder_params = {
        "embed": embed_pad.astype(jnp.bfloat16),               # [V, E_pad]
        "lstm": lstm_layers,
        "lin_w": lin_w_t.T.astype(jnp.bfloat16),               # [H, V]
        "lin_b": lin_b.reshape(1, VOCAB),
    }

    params = {"encoder": encoder_params, "decoder": decoder_params}

    out = cnn_to_rnn_forward(images, captions, params, ks[12])
    jax.block_until_ready(out)
    assert out.shape == (T + 1, B, VOCAB) and out.dtype == jnp.float32
    print("KERNEL_OK")
</pallas_src>

<mosaic_0001>
module attributes {stable_mosaic.version = 11 : i64} {
  func.func @encoder_kernel(%arg0: i32, %arg1: memref<1x256x128xbf16, #tpu.memory_space<vmem>>, %arg2: memref<128x128xbf16, #tpu.memory_space<vmem>>, %arg3: memref<1x128xf32, #tpu.memory_space<vmem>>, %arg4: memref<1x256xbf16, #tpu.memory_space<vmem>>, %arg5: memref<128x128xbf16, #tpu.memory_space<vmem>>, %arg6: memref<1x128xf32, #tpu.memory_space<vmem>>, %arg7: memref<1x1x128xf32, #tpu.memory_space<vmem>>, %arg8: memref<1x1x128xf32, #tpu.memory_space<vmem>>) attributes {dimension_semantics = [#tpu.dimension_semantics<parallel>], iteration_bounds = array<i64: 2>, scalar_prefetch = 0 : i64, scratch_operands = 0 : i64, tpu.core_type = #tpu.core_type<tc>, window_params = [{transform_indices = @transform_0, window_bounds = array<i64: 1, 256, 128>}, {pipeline_mode = #tpu.pipeline_mode<synchronous>, transform_indices = @transform_1, window_bounds = array<i64: 128, 128>}, {pipeline_mode = #tpu.pipeline_mode<synchronous>, transform_indices = @transform_2, window_bounds = array<i64: 1, 128>}, {pipeline_mode = #tpu.pipeline_mode<synchronous>, transform_indices = @transform_3, window_bounds = array<i64: 1, 256>}, {pipeline_mode = #tpu.pipeline_mode<synchronous>, transform_indices = @transform_4, window_bounds = array<i64: 128, 128>}, {pipeline_mode = #tpu.pipeline_mode<synchronous>, transform_indices = @transform_5, window_bounds = array<i64: 1, 128>}, {transform_indices = @transform_6, window_bounds = array<i64: 1, 1, 128>}, {transform_indices = @transform_7, window_bounds = array<i64: 1, 1, 128>}]} {
    %c0 = arith.constant 0 : index
    %c0_0 = arith.constant 0 : index
    %c0_1 = arith.constant 0 : index
    %0 = vector.load %arg1[%c0, %c0_0, %c0_1] : memref<1x256x128xbf16, #tpu.memory_space<vmem>>, vector<1x256x128xbf16>
    %1 = vector.shape_cast %0 : vector<1x256x128xbf16> to vector<256x128xbf16>
    %c0_2 = arith.constant 0 : index
    %c0_3 = arith.constant 0 : index
    %2 = vector.load %arg2[%c0_2, %c0_3] : memref<128x128xbf16, #tpu.memory_space<vmem>>, vector<128x128xbf16>
    %cst = arith.constant dense<0.000000e+00> : vector<256x128xf32>
    %3 = tpu.matmul %1, %2, %cst {dimension_numbers = #tpu.dot_dimension_numbers<[1], [0], [0], [1], [0, 0, 1, 1], [], []>} : vector<256x128xbf16>, vector<128x128xbf16>, vector<256x128xf32> -> vector<256x128xf32>
    %c0_4 = arith.constant 0 : index
    %c0_5 = arith.constant 0 : index
    %4 = vector.load %arg3[%c0_4, %c0_5] : memref<1x128xf32, #tpu.memory_space<vmem>>, vector<1x128xf32>
    %5 = vector.broadcast %4 : vector<1x128xf32> to vector<256x128xf32>
    %6 = arith.addf %3, %5 : vector<256x128xf32>
    %cst_6 = arith.constant 0.000000e+00 : f32
    %7 = vector.broadcast %cst_6 : f32 to vector<256x128xf32>
    %8 = arith.maximumf %6, %7 : vector<256x128xf32>
    %c0_7 = arith.constant 0 : index
    %c0_8 = arith.constant 0 : index
    %9 = vector.load %arg4[%c0_7, %c0_8] : memref<1x256xbf16, #tpu.memory_space<vmem>>, vector<1x256xbf16>
    %10 = arith.truncf %8 : vector<256x128xf32> to vector<256x128xbf16>
    %cst_9 = arith.constant dense<0.000000e+00> : vector<1x128xf32>
    %11 = tpu.matmul %9, %10, %cst_9 {dimension_numbers = #tpu.dot_dimension_numbers<[1], [0], [0], [1], [0, 0, 1, 1], [], []>} : vector<1x256xbf16>, vector<256x128xbf16>, vector<1x128xf32> -> vector<1x128xf32>
    %cst_10 = arith.constant 3.906250e-03 : f32
    %12 = vector.broadcast %cst_10 : f32 to vector<1x128xf32>
    %13 = arith.mulf %11, %12 : vector<1x128xf32>
    %14 = arith.truncf %13 : vector<1x128xf32> to vector<1x128xbf16>
    %c0_11 = arith.constant 0 : index
    %c0_12 = arith.constant 0 : index
    %15 = vector.load %arg5[%c0_11, %c0_12] : memref<128x128xbf16, #tpu.memory_space<vmem>>, vector<128x128xbf16>
    %cst_13 = arith.constant dense<0.000000e+00> : vector<1x128xf32>
    %16 = tpu.matmul %14, %15, %cst_13 {dimension_numbers = #tpu.dot_dimension_numbers<[1], [0], [0], [1], [0, 0, 1, 1], [], []>} : vector<1x128xbf16>, vector<128x128xbf16>, vector<1x128xf32> -> vector<1x128xf32>
    %c0_14 = arith.constant 0 : index
    %c0_15 = arith.constant 0 : index
    %17 = vector.load %arg6[%c0_14, %c0_15] : memref<1x128xf32, #tpu.memory_space<vmem>>, vector<1x128xf32>
    %18 = arith.addf %16, %17 : vector<1x128xf32>
    %cst_16 = arith.constant 0.000000e+00 : f32
    %19 = vector.broadcast %cst_16 : f32 to vector<1x128xf32>
    %20 = arith.maximumf %18, %19 : vector<1x128xf32>
    %c0_17 = arith.constant 0 : index
    %c0_18 = arith.constant 0 : index
    %c0_19 = arith.constant 0 : index
    %21 = vector.load %arg7[%c0_17, %c0_18, %c0_19] : memref<1x1x128xf32, #tpu.memory_space<vmem>>, vector<1x1x128xf32>
    %22 = vector.shape_cast %21 : vector<1x1x128xf32> to vector<1x128xf32>
    %cst_20 = arith.constant 5.000000e-01 : f32
    %23 = vector.broadcast %cst_20 : f32 to vector<1x128xf32>
    %24 = arith.cmpf olt, %22, %23 : vector<1x128xf32>
    %cst_21 = arith.constant 2.000000e+00 : f32
    %25 = vector.broadcast %cst_21 : f32 to vector<1x128xf32>
    %26 = arith.mulf %20, %25 : vector<1x128xf32>
    %cst_22 = arith.constant 0.000000e+00 : f32
    %27 = vector.broadcast %cst_22 : f32 to vector<1x128xf32>
    %28 = arith.select %24, %26, %27 : vector<1x128xi1>, vector<1x128xf32>
    %c0_23 = arith.constant 0 : index
    %c0_24 = arith.constant 0 : index
    %c0_25 = arith.constant 0 : index
    %29 = vector.load %arg8[%c0_23, %c0_24, %c0_25] : memref<1x1x128xf32, #tpu.memory_space<vmem>>, vector<1x1x128xf32>
    %30 = vector.shape_cast %29 : vector<1x1x128xf32> to vector<1x128xf32>
    %31 = vector.shape_cast %28 : vector<1x128xf32> to vector<1x1x128xf32>
    tpu.vector_store %arg8[%c0_23, %c0_24, %c0_25], %31 {strides = array<i32>} : memref<1x1x128xf32, #tpu.memory_space<vmem>>, vector<1x1x128xf32>,
    return
  }
  func.func @transform_0(%arg0: i32) -> (i32, i32, i32) {
    %c0_i32 = arith.constant 0 : i32
    %c0_i32_0 = arith.constant 0 : i32
    %c0_i32_1 = arith.constant 0 : i32
    return %arg0, %c0_i32, %c0_i32_0 : i32, i32, i32
  }
  func.func @transform_1(%arg0: i32) -> (i32, i32) {
    %c0_i32 = arith.constant 0 : i32
    %c0_i32_0 = arith.constant 0 : i32
    %c0_i32_1 = arith.constant 0 : i32
    return %c0_i32, %c0_i32_0 : i32, i32
  }
  func.func @transform_2(%arg0: i32) -> (i32, i32) {
    %c0_i32 = arith.constant 0 : i32
    %c0_i32_0 = arith.constant 0 : i32
    %c0_i32_1 = arith.constant 0 : i32
    return %c0_i32, %c0_i32_0 : i32, i32
  }
  func.func @transform_3(%arg0: i32) -> (i32, i32) {
    %c0_i32 = arith.constant 0 : i32
    %c0_i32_0 = arith.constant 0 : i32
    %c0_i32_1 = arith.constant 0 : i32
    return %c0_i32, %c0_i32_0 : i32, i32
  }
  func.func @transform_4(%arg0: i32) -> (i32, i32) {
    %c0_i32 = arith.constant 0 : i32
    %c0_i32_0 = arith.constant 0 : i32
    %c0_i32_1 = arith.constant 0 : i32
    return %c0_i32, %c0_i32_0 : i32, i32
  }
  func.func @transform_5(%arg0: i32) -> (i32, i32) {
    %c0_i32 = arith.constant 0 : i32
    %c0_i32_0 = arith.constant 0 : i32
    %c0_i32_1 = arith.constant 0 : i32
    return %c0_i32, %c0_i32_0 : i32, i32
  }
  func.func @transform_6(%arg0: i32) -> (i32, i32, i32) {
    %c0_i32 = arith.constant 0 : i32
    %c0_i32_0 = arith.constant 0 : i32
    %c0_i32_1 = arith.constant 0 : i32
    return %arg0, %c0_i32, %c0_i32_0 : i32, i32, i32
  }
  func.func @transform_7(%arg0: i32) -> (i32, i32, i32) {
    %c0_i32 = arith.constant 0 : i32
    %c0_i32_0 = arith.constant 0 : i32
    %c0_i32_1 = arith.constant 0 : i32
    return %arg0, %c0_i32, %c0_i32_0 : i32, i32, i32
  }
}

</mosaic_0001>

<bundles_post_ra>
// kernel: tpu_custom_call.1
= control target key start
LH: loop header
LB: loop body
LE: loop exit
PB: predicated region body
PF: predicated region fallthrough
CT: control target
= control target key end

     0   :  { %s1802_s0 = inlined_call_operand.hbm [shape: bf16[2,256,128], index: 0, kind: input, shape index: {}]   ;;  %s1803_s1 = inlined_call_operand.hbm [shape: bf16[128,128], index: 1, kind: input, shape index: {}]   ;;  %s1804_s2 = inlined_call_operand.vmem [shape: f32[1,128], index: 2, kind: input, shape index: {}]   ;;  %s1805_s3 = inlined_call_operand.vmem [shape: bf16[1,256], index: 3, kind: input, shape index: {}]   ;;  %s1806_s4 = inlined_call_operand.hbm [shape: bf16[128,128], index: 4, kind: input, shape index: {}]   ;;  %s1807_s5 = inlined_call_operand.vmem [shape: f32[1,128], index: 5, kind: input, shape index: {}]   ;;  %s1808_s6 = inlined_call_operand.vmem [shape: f32[2,1,128], index: 6, kind: input, shape index: {}]   ;;  %s1809_s7 = inlined_call_operand.hbm [shape: f32[2,1,128], index: 7, kind: output, shape index: {}]  }
   0x1   :  { %1816 = sst [smem:[#allocation12_spill]] %s1803_s1 }
   0x2   :  { %12 = vsyncpa [#allocation3], 0 }
   0x3   :  { %14 = vsyncpa [#allocation3 + $0x1], 0 }
   0x4   :  { %15 = vsyncpa [#allocation6], 0 }
   0x5   :  { %16 = vsyncpa [#allocation4], 0 }
   0x6   :  { %18 = vsyncpa [#allocation4 + $0x1], 0  ;;  %s1510_s24 = smov 0   ;;  %s1512_s25 = smov 0  }
   0x7   :  { %s1514_s26 = smov 0   ;;  %s1516_s27 = smov 0  }
   0x8 LB: > { %s1531_s28 = sadd.s32 4294967295, %s1459_s27   ;;  %s1034_s29 = sadd.s32 4294967294, %s1459_s27   ;;  %s1459_s27 = sphi %s1516_s27, %s1836_s27   ;;  %s1455_s26 = sphi %s1514_s26, %s1835_s26   ;;  %s1451_s25 = sphi %s1512_s25, %s1834_s25   ;;  %s1447_s24 = sphi %s1510_s24, %s1833_s24  }
   0x9   : > { %p44_p0 = scmp.ne.s32.totalorder %s1451_s25, %s1447_s24  ;;  %p1811_p1 = scmp.eq.s32.totalorder %s1531_s28, 0 }
   0xa   : > { %p199_p2 = scmp.eq.s32.totalorder %s1531_s28, 1  ;;  %p205_p3 = scmp.eq.s32.totalorder %s1034_s29, 1 }
   0xb   : > { %p1540_p4 = por %p1811_p1, %p44_p0  ;;  %p1035_p5 = scmp.ge.s32.totalorder %s1459_s27, 1 }
   0xc   : > { %p1545_p6 = por %p205_p3, %p44_p0  ;;  %p212_p7 = scmp.lt.s32.totalorder %s1459_s27, 3 }
   0xd   : > { %s1817_s30 = scalar_select %p1540_p4, 1, 0 }
   0xe   : > { %s1818_s8 = scalar_select %p1545_p6, 1, 0 }
   0xf   : > { %p1550_p8 = pnand %p1035_p5, %p212_p7  ;;  %s1461_s10 = smov [#allocation5]  }
  0x10   : > { %s224_s11 = sshll.u32 %s1461_s10, 4  ;;  %s1462_s13 = smov [#allocation7]   ;;  %s225_s11 = int_to_ptr.vmem [resolvable:$true] %s224_s11 }
  0x11   : > { %s1819_s9 = scalar_select %p1550_p8, 1, 0 }
  0x12   : > { %p1219_p9 = pneg %p1550_p8  ;;  %s243_s14 = sshll.u32 %s1462_s13, 4  ;;  %s244_s14 = int_to_ptr.vmem [resolvable:$true] %s243_s14 }
  0x13   : > { %s1322_s15 = scalar_lea.vmem %s225_s11, 1024  ;;  %p1330_p5 = scmp.lt.s32.totalorder %s225_s11, %s225_s11 }
  0x14   : > { %p1559_p11 = pnand %p1219_p9, %p1811_p1  ;;  %p1323_p13 = scmp.ne.s32.totalorder %s225_s11, %s1322_s15 }
  0x15   : > { %p1331_p7 = scmp.lt.s32.totalorder %s1322_s15, %s1322_s15 }
  0x16   : > { %p1313_p12 = pneg %p1559_p11 }
  0x17   : > { %p1332_p10 = por %p1331_p7, %p1330_p5 }
  0x18   : > { %p1325_p0 = pnand %p1323_p13, %p1313_p12 }
  0x1a   : > { %p1326_p3 = pneg %p1325_p0 }
  0x1c   : > { %p1333_p9 = pnand %p1332_p10, %p1326_p3 }
  0x1e   : > { %1336 = shalt.err (!%p1333_p9)
}
  0x1f   : > { %s1810_s16 = smov 64   ;;  %s1812_s17 = smov 4  }
  0x20   : > { %s1821_s1 = sld [smem:[#allocation12_spill]]  ;;  %s1348_s20 = scalar_lea.vmem %s244_s14, 1024 }
  0x21   : > { %p1349_p13 = scmp.ne.s32.totalorder %s244_s14, %s1348_s20  ;;  %p1356_p10 = scmp.lt.s32.totalorder %s244_s14, %s244_s14 }
  0x22   : > { %p1357_p3 = scmp.lt.s32.totalorder %s1348_s20, %s1348_s20 }
  0x23   : > { %p1351_p0 = pnand %p1349_p13, %p1313_p12 }
  0x24   : > { %p1358_p7 = por %p1357_p3, %p1356_p10 }
  0x25   : > { %p1352_p5 = pneg %p1351_p0 }
  0x26   : > { %1222 = dma.hbm_to_vmem [thread:$0]  (!%p1559_p11), %s1821_s1, 1024, %s225_s11, [#allocation6], %s1810_s16, %s1810_s16, %s1812_s17  }
  0x27   : > { %p1359_p9 = pnand %p1358_p7, %p1352_p5 }
  0x29   : > { %1362 = shalt.err (!%p1359_p9)
}
  0x2a   : > { %1225 = dma.hbm_to_vmem [thread:$0]  (!%p1559_p11), %s1806_s4, 1024, %s244_s14, [#allocation6], %s1810_s16, %s1810_s16, %s1812_s17  }
  0x2b   : > { %s1588_s23 = sadd.s32 1, %s1459_s27   ;;  %s31_s29 = sadd.s32 1, %s1455_s26 }
  0x2c   : > { %s28_s10 = ssub.s32 %s1459_s27, %s1588_s23  ;;  %p38_p12 = scmp.ne.s32.totalorder %s1455_s26, %s1451_s25 }
  0x2d   : > { %p29_p13 = scmp.eq.s32.totalorder %s28_s10, 0  ;;  %p39_p0 = scmp.eq.s32.totalorder %s1459_s27, 0 }
  0x2e   : > { %p1598_p5 = por %p199_p2, %p38_p12  ;;  %p1236_p10 = scmp.lt.s32.totalorder %s1459_s27, 2 }
  0x2f   : > { %s1604_s12 = scalar_select %p29_p13, %s1455_s26, %s31_s29  }
  0x30   : > { %s1822_s11 = scalar_select %p1598_p5, 1, 0 }
  0x31   : > { %p40_p3 = por %p39_p0, %p38_p12  ;;  %s260_s13 = sand.u32 1, %s1455_s26  }
  0x32   : > { %s1039_s15 = sshll.u32 %s260_s13, 7  ;;  %s1083_s14 = sshll.u32 %s1459_s27, 11 }
  0x33   : > { %s1611_s20 = scalar_lea.hbm %s1802_s0, %s1083_s14  ;;  %s264_s21 = scalar_lea.vmem [#allocation2], %s1039_s15 }
  0x34   : > { %s271_s22 = sshll.u32 %s264_s21, 4  ;;  %p1615_p2 = pnand %p1236_p10, %p40_p3  ;;  %s1613_s22 = int_to_ptr.vmem [resolvable:$true] %s271_s22 }
  0x35   : > { %s1619_s29 = scalar_lea.sflag [#allocation3], %s260_s13  ;;  %s1363_s16 = scalar_lea.hbm %s1611_s20, 2048 }
  0x36   : > { %p1364_p11 = scmp.ne.s32.totalorder %s1611_s20, %s1363_s16  ;;  %p1365_p7 = pneg %p1615_p2 }
  0x37   : > { %s1368_s15 = scalar_lea.hbm %s1802_s0, 4096  ;;  %p1369_p13 = scmp.lt.s32.totalorder %s1611_s20, %s1802_s0 }
  0x38   : > { %p1366_p9 = pnand %p1365_p7, %p1364_p11  ;;  %p1370_p0 = scmp.lt.s32.totalorder %s1368_s15, %s1363_s16 }
  0x3a   : > { %p1367_p12 = pneg %p1366_p9  ;;  %p1371_p10 = por %p1370_p0, %p1369_p13 }
  0x3c   : > { %p1372_p3 = pnand %p1371_p10, %p1367_p12 }
  0x3e   : > { %1375 = shalt.err (!%p1372_p3)
}
  0x3f   : > { %s1376_s13 = scalar_lea.vmem %s1613_s22, 2048  ;;  %s1465_s17 = smov [#allocation2]  }
  0x40   : > { %p1377_p1 = scmp.ne.s32.totalorder %s1613_s22, %s1376_s13  ;;  %s1381_s1 = sshll.u32 %s1465_s17, 4  ;;  %s1382_s1 = int_to_ptr.vmem [resolvable:$false] %s1381_s1 }
  0x41   : > { %s1383_s14 = scalar_lea.vmem %s1382_s1, 4096  ;;  %p1384_p9 = scmp.lt.s32.totalorder %s1613_s22, %s1382_s1 }
  0x42   : > { %p1379_p6 = pnand %p1377_p1, %p1365_p7  ;;  %p1385_p5 = scmp.lt.s32.totalorder %s1383_s14, %s1376_s13 }
  0x44   : > { %p1380_p11 = pneg %p1379_p6  ;;  %p1386_p4 = por %p1385_p5, %p1384_p9 }
  0x46   : > { %p1387_p8 = pnand %p1386_p4, %p1380_p11 }
  0x48   : > { %1390 = shalt.err (!%p1387_p8)
}
  0x49   : > { %s1824_s16 = smov 4   ;;  %s1825_s18 = smov 64  }
  0x4a   : > { %1229 = dma.hbm_to_vmem [thread:$0]  (!%p1615_p2), %s1611_s20, 2048, %s1613_s22, %s1619_s29, %s1825_s18, %s1825_s18, %s1824_s16  }
  0x4b   : > { %p1826_p1 = scmp.ne.s32.totalorder %s1819_s9, 0 }
  0x4c   : > { %s1646_s17 = sand.u32 (!%p1826_p1), 1, %s1451_s25   ;;  %p1827_p4 = scmp.ne.s32.totalorder (!%p1826_p1), %s1817_s30, 0 }
  0x4d   : > { %289 = sbr.rel (%p1826_p1) target bundleno = 824 (0x338), region = 48  ;;  %s1043_s1 = sshll.u32 (!%p1826_p1), %s1646_s17, 7 }
  0x4e   : > { %s292_s15 = scalar_lea.sflag (!%p1826_p1), [#allocation3], %s1646_s17  ;;  %s1650_s19 = scalar_lea.vmem (!%p1826_p1), [#allocation2], %s1043_s1 }
  0x52   : > { %1434 = dma.done.wait (%p1827_p4), %s292_s15, 2048  }
  0x53   : > { %1436 = vsyncadd (%p1827_p4), %s292_s15, 4294965248  ;;  %p1828_p6 = scmp.eq.s32.totalorder %s1531_s28, 0 }
  0x55   : > { %1438 = dma.done.wait (%p1828_p6), [#allocation6], 2048   ;;  %p1829_p8 = pmov %p1828_p6 }
  0x56   : > { %v1279_v0 = vld [vmem:[#allocation5 + $0x38] sm:$0xff]   ;;  %v1280_v1 = vld [vmem:[#allocation5 + $0x30] sm:$0xff]   ;;  %v1281_v2 = vld [vmem:[#allocation5 + $0x28] sm:$0xff]   ;;  %v1466_v24 = vmov 1966171168   ;;  %v761_v26 = vlaneseq  ;;  %vm1468_vm0 = vmmov 0  }
  0x57   : > { %1440 = vsyncadd (%p1829_p8), [#allocation6], 4294965248  ;;  %1139 = vmatprep.subr.bf16.mxu0 %v1279_v0  ;;  %v1282_v3 = vld [vmem:[#allocation5 + $0x20] sm:$0xff]   ;;  %v1283_v5 = vld [vmem:[#allocation5 + $0x18] sm:$0xff]   ;;  %v759_v25 = vunpack.c.l.s4 %v1466_v24  ;;  %p336_p5 = scmp.lt.s32.totalorder %s1531_s28, 1  ;;  %s1080_s18 = sshll.u32 %s1531_s28, 4 }
  0x58   : > { %1140 = vmatpush3.bf16.msra.mxu0 %v1279_v0  ;;  %v1287_v4 = vld [vmem:[%s1650_s19] sm:$0xff]   ;;  %v1284_v6 = vld [vmem:[#allocation5 + $0x10] sm:$0xff]   ;;  %v1285_v7 = vld [vmem:[#allocation5 + $0x8] sm:$0xff]   ;;  %v762_v28 = vshrl.u32 %v761_v26, 7  ;;  %s335_s1 = scalar_lea.vmem [#allocation8], %s1646_s17  ;;  %s1765_s9 = scalar_lea.hbm %s1809_s7, %s1080_s18 }
  0x59   : > { %1141 = vmatprep.subr.bf16.mxu0 %v1280_v1  ;;  %1155 = vmatprep.mubr.bf16.mxu0 %v1287_v4  ;;  %v1286_v8 = vld [vmem:[#allocation5] sm:$0xff]   ;;  %v1288_v9 = vld [vmem:[%s1650_s19 + $0x8] sm:$0xff]   ;;  %v1289_v10 = vld [vmem:[%s1650_s19 + $0x10] sm:$0xff]   ;;  %v760_v27 = vunpack.c.0.s8 %v759_v25  ;;  %s337_s10 = scalar_select %p336_p5, %s1531_s28, 1 }
  0x5a   : > { %v1290_v11 = vld [vmem:[%s1650_s19 + $0x18] sm:$0xff]   ;;  %v1291_v12 = vld [vmem:[%s1650_s19 + $0x20] sm:$0xff]   ;;  %v1292_v13 = vld [vmem:[%s1650_s19 + $0x28] sm:$0xff]   ;;  %s940_s15 = sshll.u32 %s335_s1, 4  ;;  %s928_s20 = scalar_lea.sflag [#allocation4], %s1646_s17  ;;  %s941_s15 = int_to_ptr.vmem [resolvable:$true] %s940_s15 }
  0x5b   : > { %v1293_v14 = vld [vmem:[%s1650_s19 + $0x30] sm:$0xff]   ;;  %v1294_v15 = vld [vmem:[%s1650_s19 + $0x38] sm:$0xff]   ;;  %v1295_v16 = vld [vmem:[%s1650_s19 + $0x40] sm:$0xff]   ;;  %v1683_v31 = vsub.s32 %v760_v27, %v762_v28  ;;  %s338_s13 = scalar_lea.vmem %s1808_s6, %s337_s10  ;;  %s1391_s22 = scalar_lea.vmem %s941_s15, 16 }
  0x5c   : > { %1142 = vmatpush3.bf16.msra.mxu0 %v1280_v1  ;;  %v1296_v17 = vld [vmem:[%s1650_s19 + $0x48] sm:$0xff]   ;;  %v1297_v18 = vld [vmem:[%s1650_s19 + $0x50] sm:$0xff]   ;;  %v1298_v19 = vld [vmem:[%s1650_s19 + $0x58] sm:$0xff]   ;;  %p1392_p2 = scmp.ne.s32.totalorder %s941_s15, %s1391_s22  ;;  %p1830_p7 = scmp.ne.s32.totalorder %s1822_s11, 0 }
  0x5d   : > { %1143 = vmatprep.subr.bf16.mxu0 %v1281_v2  ;;  %v1299_v20 = vld [vmem:[%s1650_s19 + $0x60] sm:$0xff]   ;;  %v1300_v21 = vld [vmem:[%s1650_s19 + $0x68] sm:$0xff]   ;;  %v1301_v22 = vld [vmem:[%s1650_s19 + $0x70] sm:$0xff]   ;;  %s1469_s28 = smov [#allocation8]  }
  0x5e   : > { %v1302_v23 = vld [vmem:[%s1650_s19 + $0x78] sm:$0xff]   ;;  %v1679_v29 = vld.sshfl [vmem:[%s1805_s3] sm:$0x11 pattern:$0x75316420]  ;;  %p1393_p12 = pnand %p1392_p2, %p1830_p7  ;;  %s1395_s10 = sshll.u32 %s1469_s28, 4  ;;  %s1396_s10 = int_to_ptr.vmem [resolvable:$false] %s1395_s10 }
  0x5f   : > { %v757_v30 = vcombine.high %v1679_v29, %v1679_v29  ;;  %v764_v33 = vrot.slane %v1679_v29, %v1683_v31  ;;  %v1691_v35 = vld [vmem:[%s1804_s2] ss:$0 sm:$0xff]  ;;  %v1309_v29 = vld [vmem:[#allocation7 + $0x8] sm:$0xff]   ;;  %s1397_s29 = scalar_lea.vmem %s1396_s10, 32  ;;  %p1398_p0 = scmp.lt.s32.totalorder %s941_s15, %s1396_s10 }
  0x60   : > { %1144 = vmatpush3.bf16.msra.mxu0 %v1281_v2  ;;  %p1394_p13 = pneg %p1393_p12  ;;  %p1399_p10 = scmp.lt.s32.totalorder %s1397_s29, %s1391_s22 }
  0x61   : > { %1145 = vmatprep.subr.bf16.mxu0 %v1282_v3  ;;  %v771_v32 = vrot.slane %v757_v30, %v1683_v31  ;;  %v1310_v31 = vld [vmem:[#allocation7] sm:$0xff]  }
  0x62   : > { %p1400_p3 = por %p1399_p10, %p1398_p0 }
  0x63   : > { %806 = vmatprep.mubr.bf16.mxu1 %v771_v32 }
  0x64   : > { %1146 = vmatpush3.bf16.msra.mxu0 %v1282_v3  ;;  %p1401_p11 = pnand %p1400_p3, %p1394_p13 }
  0x65   : > { %1147 = vmatprep.subr.bf16.mxu0 %v1283_v5 }
  0x68   : > { %1148 = vmatpush3.bf16.msra.mxu0 %v1283_v5 }
  0x69   : > { %1149 = vmatprep.subr.bf16.mxu0 %v1284_v6 }
  0x6c   : > { %1150 = vmatpush3.bf16.msra.mxu0 %v1284_v6 }
  0x6d   : > { %1151 = vmatprep.subr.bf16.mxu0 %v1285_v7 }
  0x70   : > { %1152 = vmatpush3.bf16.msra.mxu0 %v1285_v7 }
  0x71   : > { %1153 = vmatprep.subr.bf16.mxu0 %v1286_v8 }
  0x74   : > { %1154 = vmatpush3.bf16.msra.mxu0 %v1286_v8 }
  0x77   : > { %1156 = vmatmul.mubr.bf16.vlgmr.msra.gmra.mxu0 %v1288_v9 }
  0x78   : > { %1159 = vmatprep.mubr.bf16.mxu0 %v1289_v10 }
  0x7f   : > { %1160 = vmatmul.mubr.bf16.gmra.mxu0 %v1290_v11 }
  0x80   : > { %1163 = vmatprep.mubr.bf16.mxu0 %v1291_v12 }
  0x87   : > { %1164 = vmatmul.mubr.bf16.gmra.mxu0 %v1292_v13 }
  0x88   : > { %1167 = vmatprep.mubr.bf16.mxu0 %v1293_v14 }
  0x8f   : > { %1168 = vmatmul.mubr.bf16.gmra.mxu0 %v1294_v15 }
  0x90   : > { %1171 = vmatprep.mubr.bf16.mxu0 %v1295_v16 }
  0x97   : > { %1172 = vmatmul.mubr.bf16.gmra.mxu0 %v1296_v17 }
  0x98   : > { %1175 = vmatprep.mubr.bf16.mxu0 %v1297_v18 }
  0x9f   : > { %1176 = vmatmul.mubr.bf16.gmra.mxu0 %v1298_v19 }
  0xa0   : > { %1179 = vmatprep.mubr.bf16.mxu0 %v1299_v20 }
  0xa7   : > { %1180 = vmatmul.mubr.bf16.gmra.mxu0 %v1300_v21 }
  0xa8   : > { %1183 = vmatprep.mubr.bf16.mxu0 %v1301_v22 }
  0xaf   : > { %1184 = vmatmul.mubr.bf16.gmra.mxu0 %v1302_v23 }
 0x137   : > { %v1157_v34 = vpop.f32.mrf.mxu0 }
 0x138   : > { %v582_v37 = vadd.f32 %v1157_v34, %v1691_v35 }
 0x139   : > { %v573_v36 = vpop.f32.mrf.mxu0 }
 0x13a   : > { %v574_v39 = vadd.f32 %v1691_v35, %v573_v36  ;;  %v702_v42 = vmax.f32 %v582_v37, 0.0 }
 0x13b   : > { %v1158_v38 = vpop.f32.mrf.mxu0 }
 0x13c   : > { %v585_v40 = vadd.f32 %v1158_v38, %v1691_v35  ;;  %v700_v46 = vmax.f32 %v574_v39, 0.0 }
 0x13d   : > { %v576_v41 = vpop.f32.mrf.mxu0 }
 0x13e   : > { %v703_v43 = vmax.f32 %v585_v40, 0.0  ;;  %v577_v44 = vadd.f32 %v1691_v35, %v576_v41 }
 0x13f   : > { %v1161_v45 = vpop.f32.mrf.mxu0 }
 0x140   : > { %v1697_v47 = vpack.c.bf16 %v703_v43, %v702_v42  ;;  %v701_v48 = vmax.f32 %v577_v44, 0.0  ;;  %v598_v51 = vadd.f32 %v1161_v45, %v1691_v35 }
 0x141   : > { %v589_v49 = vpop.f32.mrf.mxu0 }
 0x142   : > { %v1699_v50 = vpack.c.bf16 %v701_v48, %v700_v46  ;;  %v590_v53 = vadd.f32 %v1691_v35, %v589_v49  ;;  %v706_v56 = vmax.f32 %v598_v51, 0.0 }
 0x143   : > { %v1162_v52 = vpop.f32.mrf.mxu0 }
 0x144   : > { %v601_v54 = vadd.f32 %v1162_v52, %v1691_v35  ;;  %v704_v60 = vmax.f32 %v590_v53, 0.0 }
 0x145   : > { %v592_v55 = vpop.f32.mrf.mxu0 }
 0x146   : > { %v707_v57 = vmax.f32 %v601_v54, 0.0  ;;  %v593_v58 = vadd.f32 %v1691_v35, %v592_v55 }
 0x147   : > { %v1165_v59 = vpop.f32.mrf.mxu0 }
 0x148   : > { %v1705_v61 = vpack.c.bf16 %v707_v57, %v706_v56  ;;  %v705_v62 = vmax.f32 %v593_v58, 0.0  ;;  %v614_v52 = vadd.f32 %v1165_v59, %v1691_v35 }
 0x149   : > { %v605_v63 = vpop.f32.mrf.mxu0 }
 0x14a   : > { %v1707_v0 = vpack.c.bf16 %v705_v62, %v704_v60 }
 0x14b   : > { %v1166_v1 = vpop.f32.mrf.mxu0 }
 0x14c   : > { %v617_v44 = vadd.f32 %v1166_v1, %v1691_v35 }
 0x14d   : > { %v608_v2 = vpop.f32.mrf.mxu0 }
 0x14e   : > { %v711_v56 = vmax.f32 %v617_v44, 0.0  ;;  %v609_v57 = vadd.f32 %v1691_v35, %v608_v2 }
 0x14f   : > { %v1169_v3 = vpop.f32.mrf.mxu0 }
 0x150   : > { %v630_v23 = vadd.f32 %v1169_v3, %v1691_v35  ;;  %v710_v3 = vmax.f32 %v614_v52, 0.0 }
 0x151   : > { %v621_v4 = vpop.f32.mrf.mxu0 }
 0x152   : > { %v714_v38 = vmax.f32 %v630_v23, 0.0  ;;  %v622_v39 = vadd.f32 %v1691_v35, %v621_v4  ;;  %v606_v4 = vadd.f32 %v1691_v35, %v605_v63 }
 0x153   : > { %v1170_v5 = vpop.f32.mrf.mxu0 }
 0x154   : > { %v633_v20 = vadd.f32 %v1170_v5, %v1691_v35  ;;  %v712_v53 = vmax.f32 %v622_v39, 0.0  ;;  %v708_v2 = vmax.f32 %v606_v4, 0.0  ;;  %v832_v39 = vld [vmem:[%s1807_s5] sm:$0x1] }
 0x155   : > { %v624_v6 = vpop.f32.mrf.mxu0 }
 0x156   : > { %v715_v27 = vmax.f32 %v633_v20, 0.0  ;;  %v625_v28 = vadd.f32 %v1691_v35, %v624_v6  ;;  %v738_v6 = vpack.c.bf16 %v711_v56, %v710_v3 }
 0x157   : > { %v1709_v7 = vpop.f32.mrf.mxu0 }
 0x158   : > { %v713_v45 = vmax.f32 %v625_v28, 0.0  ;;  %v740_v46 = vpack.c.bf16 %v715_v27, %v714_v38 }
 0x159   : > { %v1711_v8 = vpop.f32.mrf.mxu0 }
 0x15a   : > { %v739_v58 = vpack.c.bf16 %v713_v45, %v712_v53 }
 0x15b   : > { %v1713_v9 = vpop.f32.mrf.mxu0 }
 0x15c   : > { %v649_v63 = vadd.f32 %v1713_v9, %v1691_v35 }
 0x15d   : > { %v1715_v10 = vpop.f32.mrf.mxu0 }
 0x15f   : > { %v1177_v11 = vpop.f32.mrf.mxu0 }
 0x160   : > { %v662_v59 = vadd.f32 %v1177_v11, %v1691_v35 }
 0x161   : > { %v653_v12 = vpop.f32.mrf.mxu0 }
 0x163   : > { %v1178_v13 = vpop.f32.mrf.mxu0 }
 0x164   : > { %v665_v60 = vadd.f32 %v1178_v13, %v1691_v35  ;;  %v654_v13 = vadd.f32 %v1691_v35, %v653_v12 }
 0x165   : > { %v656_v14 = vpop.f32.mrf.mxu0 }
 0x166   : > { %v720_v23 = vmax.f32 %v654_v13, 0.0 }
 0x167   : > { %v1181_v15 = vpop.f32.mrf.mxu0 }
 0x168   : > { %v678_v40 = vadd.f32 %v1181_v15, %v1691_v35  ;;  %v709_v15 = vmax.f32 %v609_v57, 0.0 }
 0x169   : > { %v669_v16 = vpop.f32.mrf.mxu0 }
 0x16a   : > { %v726_v54 = vmax.f32 %v678_v40, 0.0  ;;  %v670_v55 = vadd.f32 %v1691_v35, %v669_v16  ;;  %v723_v16 = vmax.f32 %v665_v60, 0.0  ;;  %v737_v20 = vpack.c.bf16 %v709_v15, %v708_v2 }
 0x16b   : > { %v1182_v17 = vpop.f32.mrf.mxu0 }
 0x16c   : > { %v681_v32 = vadd.f32 %v1182_v17, %v1691_v35  ;;  %v724_v5 = vmax.f32 %v670_v55, 0.0  ;;  %v657_v17 = vadd.f32 %v1691_v35, %v656_v14  ;;  %v719_v14 = vmax.f32 %v649_v63, 0.0 }
 0x16d   : > { %v672_v18 = vpop.f32.mrf.mxu0 }
 0x16e   : > { %v727_v48 = vmax.f32 %v681_v32, 0.0  ;;  %v673_v49 = vadd.f32 %v1691_v35, %v672_v18  ;;  %v721_v11 = vmax.f32 %v657_v17, 0.0 }
 0x16f   : > { %v1185_v19 = vpop.f32.mrf.mxu0 }
 0x170   : > { %v694_v22 = vadd.f32 %v1185_v19, %v1691_v35  ;;  %v746_v62 = vpack.c.bf16 %v727_v48, %v726_v54  ;;  %v725_v1 = vmax.f32 %v673_v49, 0.0  ;;  %v722_v19 = vmax.f32 %v662_v59, 0.0 }
 0x171   : > { %v685_v21 = vpop.f32.mrf.mxu0 }
 0x172   : > { %v686_v25 = vadd.f32 %v1691_v35, %v685_v21  ;;  %v730_v34 = vmax.f32 %v694_v22, 0.0  ;;  %v745_v18 = vpack.c.bf16 %v725_v1, %v724_v5  ;;  %v744_v21 = vpack.c.bf16 %v723_v16, %v722_v19 }
 0x173   : > { %v1186_v24 = vpop.f32.mrf.mxu0  ;;  %v646_v22 = vadd.f32 %v1709_v7, %v1691_v35 }
 0x174   : > { %v697_v26 = vadd.f32 %v1186_v24, %v1691_v35  ;;  %v728_v41 = vmax.f32 %v686_v25, 0.0  ;;  %v641_v24 = vadd.f32 %v1691_v35, %v1715_v10  ;;  %v743_v25 = vpack.c.bf16 %v721_v11, %v720_v23  ;;  %v1303_v10 = vld [vmem:[#allocation7 + $0x38] sm:$0xff]  }
 0x175   : > { %v688_v30 = vpop.f32.mrf.mxu0  ;;  %v718_v12 = vmax.f32 %v646_v22, 0.0 }
 0x176   : > { %v731_v36 = vmax.f32 %v697_v26, 0.0  ;;  %v689_v37 = vadd.f32 %v1691_v35, %v688_v30  ;;  %v638_v26 = vadd.f32 %v1691_v35, %v1711_v8  ;;  %v717_v27 = vmax.f32 %v641_v24, 0.0  ;;  %v1304_v35 = vld [vmem:[#allocation7 + $0x30] sm:$0xff]  }
 0x177   : > { %v742_v9 = vpack.c.bf16 %v719_v14, %v718_v12  ;;  %v1467_v30 = vmov 0.0  }
 0x178   : > { %v729_v42 = vmax.f32 %v689_v37, 0.0  ;;  %v748_v43 = vpack.c.bf16 %v731_v36, %v730_v34  ;;  %v716_v28 = vmax.f32 %v638_v26, 0.0 }
 0x17a   : > { %v747_v51 = vpack.c.bf16 %v729_v42, %v728_v41  ;;  %1108 = vmatprep.subr.bf16.mxu1 %v748_v43  ;;  %v741_v7 = vpack.c.bf16 %v717_v27, %v716_v28  ;;  %v922_v42 = vld [vmem:[%s338_s13] sm:$0x1] }
 0x17b   : > { %1109 = vmatpush3.bf16.msra.mxu1 %v740_v46  ;;  %vm923_vm1 = vcmp.lt.f32.partialorder %v922_v42, 0.5 }
 0x17c   : > { %1110 = vmatprep.subr.bf16.mxu1 %v747_v51 }
 0x17f   : > { %1111 = vmatpush3.bf16.msra.mxu1 %v739_v58 }
 0x180   : > { %1112 = vmatprep.subr.bf16.mxu1 %v746_v62 }
 0x183   : > { %1113 = vmatpush3.bf16.msra.mxu1 %v738_v6 }
 0x184   : > { %1114 = vmatprep.subr.bf16.mxu1 %v745_v18 }
 0x187   : > { %1115 = vmatpush3.bf16.msra.mxu1 %v737_v20 }
 0x188   : > { %1116 = vmatprep.subr.bf16.mxu1 %v744_v21 }
 0x18b   : > { %1117 = vmatpush3.bf16.msra.mxu1 %v1705_v61  ;;  %v1305_v61 = vld [vmem:[#allocation7 + $0x28] sm:$0xff]  }
 0x18c   : > { %1118 = vmatprep.subr.bf16.mxu1 %v743_v25 }
 0x18f   : > { %1119 = vmatpush3.bf16.msra.mxu1 %v1707_v0  ;;  %v1306_v0 = vld [vmem:[#allocation7 + $0x20] sm:$0xff]  }
 0x190   : > { %1120 = vmatprep.subr.bf16.mxu1 %v742_v9 }
 0x193   : > { %1121 = vmatpush3.bf16.msra.mxu1 %v1697_v47  ;;  %v1307_v47 = vld [vmem:[#allocation7 + $0x18] sm:$0xff]  }
 0x194   : > { %1122 = vmatprep.subr.bf16.mxu1 %v741_v7 }
 0x197   : > { %1123 = vmatpush3.bf16.msra.mxu1 %v1699_v50  ;;  %v1308_v50 = vld [vmem:[#allocation7 + $0x10] sm:$0xff]  }
 0x198   : > { %1187 = vmatprep.subr.bf16.mxu1 %v1467_v30 }
 0x19a   : > { %807 = vmatmul.mubr.bf16.vlgmr.msra.gmra.mxu1 %v764_v33 }
 0x19b   : > { %1188 = vmatpush3.bf16.msra.mxu1 %v1303_v10  ;;  %1203 = vmatprep.mubr.msk.bf16.mxu1 %vm1468_vm0, %v1467_v30 }
 0x19c   : > { %1189 = vmatprep.subr.bf16.mxu1 %v1467_v30 }
 0x19f   : > { %1190 = vmatpush3.bf16.msra.mxu1 %v1304_v35 }
 0x1a0   : > { %1191 = vmatprep.subr.bf16.mxu1 %v1467_v30 }
 0x1a3   : > { %1192 = vmatpush3.bf16.msra.mxu1 %v1305_v61 }
 0x1a4   : > { %1193 = vmatprep.subr.bf16.mxu1 %v1467_v30 }
 0x1a7   : > { %1194 = vmatpush3.bf16.msra.mxu1 %v1306_v0 }
 0x1a8   : > { %1195 = vmatprep.subr.bf16.mxu1 %v1467_v30 }
 0x1ab   : > { %1196 = vmatpush3.bf16.msra.mxu1 %v1307_v47 }
 0x1ac   : > { %1197 = vmatprep.subr.bf16.mxu1 %v1467_v30 }
 0x1af   : > { %1198 = vmatpush3.bf16.msra.mxu1 %v1308_v50 }
 0x1b0   : > { %1199 = vmatprep.subr.bf16.mxu1 %v1467_v30 }
 0x1b3   : > { %1200 = vmatpush3.bf16.msra.mxu1 %v1309_v29 }
 0x1b4   : > { %1201 = vmatprep.subr.bf16.mxu1 %v1467_v30 }
 0x1b7   : > { %1202 = vmatpush3.bf16.msra.mxu1 %v1310_v31 }
 0x25a   : > { %v1124_v33 = vpop.f32.mrf.mxu1 }
 0x25c   : > { %v1125_v8 = vpop.f32.mrf.mxu1 }
 0x25d   : > { %v1126_v32 = vadd.f32 %v1125_v8, %v1124_v33 }
 0x25e   : > { %v1127_v34 = vpop.f32.mrf.mxu1 }
 0x25f   : > { %v814_v36 = vmul.f32 0.00390625, %v1126_v32 }
 0x260   : > { %v1128_v37 = vpop.f32.mrf.mxu1 }
 0x261   : > { %v815_v38 = vpack.c.bf16 %v814_v36, %v814_v36 }
 0x263   : > { %1204 = vmatmul.mubr.bf16.vlgmr.msra.gmra.mxu1 %v815_v38 }
 0x323   : > { %v915_v40 = vpop.f32.mrf.mxu1 }
 0x324   : > { %v916_v41 = vadd.f32 %v915_v40, %v832_v39 }
 0x325   : > { %v1205_v43 = vpop.f32.mrf.mxu1 }
 0x326   : > { %v921_v44 = vmax.f32 %v916_v41, 0.0 }
 0x327   : > { %v918_v45 = vpop.f32.mrf.mxu1 }
 0x328   : > { %v924_v46 = vmul.f32 2.0, %v921_v44 }
 0x329   : > { %v1206_v48 = vpop.f32.mrf.mxu1 }
 0x32a   : > { %v925_v49 = vsel %vm923_vm1, %v924_v46, 0.0 }
 0x32b   : > { %926 = vst [vmem:[%s335_s1] sm:$0x1] %v925_v49 }
 0x32c   : > { %1404 = shalt.err (!%p1401_p11)
}
 0x32d   : > { %s1405_s21 = scalar_lea.hbm %s1765_s9, 16  ;;  %s1409_s14 = scalar_lea.hbm %s1809_s7, 32 }
 0x32e   : > { %p1406_p9 = scmp.ne.s32.totalorder %s1765_s9, %s1405_s21  ;;  %p1410_p6 = scmp.lt.s32.totalorder %s1765_s9, %s1809_s7 }
 0x32f   : > { %p1411_p8 = scmp.lt.s32.totalorder %s1409_s14, %s1405_s21 }
 0x330   : > { %p1407_p1 = pnand %p1406_p9, %p1830_p7 }
 0x331   : > { %p1412_p5 = por %p1411_p8, %p1410_p6 }
 0x332   : > { %p1408_p4 = pneg %p1407_p1 }
 0x334   : > { %p1413_p2 = pnand %p1412_p5, %p1408_p4 }
 0x336   : > { %1416 = shalt.err (!%p1413_p2)
}
 0x337   : > { %1217 = dma.vmem_to_hbm [thread:$0]  (%p1830_p7), %s941_s15, 16, %s1765_s9, %s928_s20  }
 0x338 PF: > { %s952_s1 = sand.u32 1, %s1447_s24   ;;  %p1831_p12 = scmp.ne.s32.totalorder %s1818_s8, 0 }
 0x339   : > { %p1832_p13 = scmp.ge.s32.totalorder %s1459_s27, 2  ;;  %s953_s19 = scalar_lea.sflag [#allocation4], %s952_s1 }
 0x33b   : > { %p1231_p0 = pnand %p1832_p13, %p1831_p12 }
 0x33d   : > { %p1232_p10 = pneg %p1231_p0 }
 0x33f   : > { %1442 = dma.done.wait (%p1232_p10), %s953_s19, 16  }
 0x340   : > { %1444 = vsyncadd (%p1232_p10), %s953_s19, 4294967280  ;;  %p21_p3 = scmp.ge.s32.totalorder %s1588_s23, 4   ;;  %s1833_s24 = smov %s1451_s25 }
 0x341   : > { %s1834_s25 = smov %s1455_s26  ;;  %s1835_s26 = smov %s1604_s12 }
 0x342   : > { %s1836_s27 = smov %s1588_s23  ;;  %23 = sbr.rel (!%p21_p3) target bundleno = 8 (0x8), region = 104 }
 0x347   :  { %957 = vsyncpa [#allocation3], 1 }
 0x348   :  { %959 = vsyncpa [#allocation3 + $0x1], 1 }
 0x349   :  { %960 = vsyncpa [#allocation6], 1 }
 0x34a   :  { %961 = vsyncpa [#allocation4], 1 }
 0x34b   :  { %963 = vsyncpa [#allocation4 + $0x1], 1 }

</bundles_post_ra>
